<compile_context>
chip_gen: v6e
topology: v6e:2x2x1
jax: 0.10.0
libtpu: 0.0.40
codegen_flags: <defaults>
</compile_context>

<pallas_src>
import functools

import jax
import jax.numpy as jnp
from jax.experimental import pallas as pl
from jax.experimental.pallas import tpu as pltpu


def _label_smoothing_kernel(x_ref, tgt_ref, out_ref, acc_ref, *,
                            confidence, smoothing, inv_c, n_valid,
                            tile_n, n_inner, masked):
    """One grid step processes a (tile_n, C) slab of logits.

    x_ref   : (tile_n, C) logits (native dtype, cast to f32 here)
    tgt_ref : (tile_n, 1) int32 class indices
    out_ref : (1, 8, 128) f32 per-outer partial-sum block (written at finalize)
    acc_ref : (tile_n, 1) f32 scratch accumulator (persists across inner steps)
    """
    o = pl.program_id(0)
    i = pl.program_id(1)

    @pl.when(i == 0)
    def _init():
        acc_ref[...] = jnp.zeros_like(acc_ref)

    x = x_ref[...].astype(jnp.float32)                       # (tile_n, C)
    labels = tgt_ref[...]                                    # (tile_n, 1) int32

    # Numerically stable log-sum-exp per row.
    row_max = jnp.max(x, axis=-1, keepdims=True)             # (tile_n, 1)
    lse = row_max + jnp.log(
        jnp.sum(jnp.exp(x - row_max), axis=-1, keepdims=True))

    # x[n, target[n]] via lane-iota == label compare (in-kernel "gather").
    class_ids = jax.lax.broadcasted_iota(jnp.int32, x.shape, 1)
    onehot = (class_ids == labels).astype(jnp.float32)       # (tile_n, C)
    x_tgt = jnp.sum(x * onehot, axis=-1, keepdims=True)      # (tile_n, 1)
    x_mean = jnp.sum(x, axis=-1, keepdims=True) * inv_c      # (tile_n, 1)

    nll = lse - x_tgt
    smooth = lse - x_mean
    row_loss = confidence * nll + smoothing * smooth         # (tile_n, 1)

    if masked:  # static: only emitted when the batch was padded
        row_in_tile = jax.lax.broadcasted_iota(jnp.int32, (tile_n, 1), 0)
        global_row = (o * n_inner + i) * tile_n + row_in_tile
        row_loss = jnp.where(global_row < n_valid, row_loss, 0.0)

    acc_ref[...] += row_loss

    @pl.when(i == n_inner - 1)
    def _finalize():
        partial = jnp.sum(acc_ref[...])                      # single final reduce
        out_ref[...] = jnp.broadcast_to(partial, out_ref.shape)


def label_smoothing_loss(logits, target, *, smoothing=0.0, tile_n=2048):
    """Pallas equivalent of LabelSmoothing(smoothing).forward(x, target)."""
    N, C = logits.shape
    confidence = 1.0 - float(smoothing)

    def _round_up(a, b):
        return ((a + b - 1) // b) * b

    # Tile sizing: big lane-dense slabs, clamped to ~4 MiB per block so the
    # double-buffered pipeline fits comfortably even in v7x's 64 MiB VMEM.
    bytes_per_row = C * jnp.dtype(logits.dtype).itemsize
    budget_rows = max(8, ((4 << 20) // max(1, bytes_per_row)) // 8 * 8)
    tile_n = min(int(tile_n), budget_rows, _round_up(N, 8))
    tile_n = max(8, _round_up(tile_n, 8))

    n_tiles = pl.cdiv(N, tile_n)
    n_pad = n_tiles * tile_n
    n_outer = 2 if (n_tiles % 2 == 0 and n_tiles >= 2) else 1  # v7x: 2 TCs
    n_inner = n_tiles // n_outer

    x = logits                                   # keep native dtype (no HBM f32 copy)
    tgt = target.astype(jnp.int32).reshape(N, 1)
    if n_pad != N:
        x = jnp.pad(x, ((0, n_pad - N), (0, 0)))
        tgt = jnp.pad(tgt, ((0, n_pad - N), (0, 0)))

    kernel = functools.partial(
        _label_smoothing_kernel,
        confidence=confidence,
        smoothing=float(smoothing),
        inv_c=1.0 / C,
        n_valid=N,
        tile_n=tile_n,
        n_inner=n_inner,
        masked=(n_pad != N),
    )

    partials = pl.pallas_call(
        kernel,
        out_shape=jax.ShapeDtypeStruct((n_outer, 8, 128), jnp.float32),
        grid_spec=pltpu.PrefetchScalarGridSpec(
            num_scalar_prefetch=0,
            grid=(n_outer, n_inner),
            in_specs=[
                pl.BlockSpec((tile_n, C), lambda o, i: (o * n_inner + i, 0)),
                pl.BlockSpec((tile_n, 1), lambda o, i: (o * n_inner + i, 0)),
            ],
            # Per-outer partial sums: each TC owns its own output block.
            out_specs=pl.BlockSpec((1, 8, 128), lambda o, i: (o, 0, 0)),
            scratch_shapes=[pltpu.VMEM((tile_n, 1), jnp.float32)],
        ),
        compiler_params=pltpu.CompilerParams(
            dimension_semantics=("parallel", "arbitrary"),
        ),
    )(x, tgt)

    return jnp.sum(partials[:, 0, 0]) / N        # 'mean' over the true batch


def _reference(x, target, smoothing):
    logp = jax.nn.log_softmax(x.astype(jnp.float32), axis=-1)
    nll = -jnp.take_along_axis(logp, target[:, None].astype(jnp.int32), axis=-1)[:, 0]
    smooth = -jnp.mean(logp, axis=-1)
    return jnp.mean((1.0 - smoothing) * nll + smoothing * smooth)


if __name__ == "__main__":
    key = jax.random.PRNGKey(0)
    k1, k2, k3, k4 = jax.random.split(key, 4)

    # Case 1: small shape consistent with the module's forward (N, num_classes).
    N1, C1 = 8, 64
    x1 = jax.random.normal(k1, (N1, C1), dtype=jnp.float32)
    t1 = jax.random.randint(k2, (N1,), 0, C1, dtype=jnp.int32)
    out1 = jax.block_until_ready(label_smoothing_loss(x1, t1, smoothing=0.1))
    ref1 = _reference(x1, t1, 0.1)
    assert jnp.allclose(out1, ref1, rtol=1e-5, atol=1e-5), (out1, ref1)

    # Case 2: ragged batch, bf16 logits, multi-tile / masked path, smoothing=0.
    N2, C2 = 50, 96
    x2 = jax.random.normal(k3, (N2, C2), dtype=jnp.bfloat16)
    t2 = jax.random.randint(k4, (N2,), 0, C2, dtype=jnp.int32)
    out2 = jax.block_until_ready(
        label_smoothing_loss(x2, t2, smoothing=0.0, tile_n=16))
    ref2 = _reference(x2, t2, 0.0)
    assert jnp.allclose(out2, ref2, rtol=1e-5, atol=1e-5), (out2, ref2)

    print("KERNEL_OK")
</pallas_src>

<mosaic_0001>
module attributes {stable_mosaic.version = 11 : i64} {
  func.func @_label_smoothing_kernel(%arg0: i32, %arg1: i32, %arg2: memref<8x64xf32, #tpu.memory_space<vmem>>, %arg3: memref<8x1xi32, #tpu.memory_space<vmem>>, %arg4: memref<1x8x128xf32, #tpu.memory_space<vmem>>, %arg5: memref<8x1xf32, #tpu.memory_space<vmem>>) attributes {dimension_semantics = [#tpu.dimension_semantics<parallel>, #tpu.dimension_semantics<arbitrary>], iteration_bounds = array<i64: 1, 1>, scalar_prefetch = 0 : i64, scratch_operands = 1 : i64, tpu.core_type = #tpu.core_type<tc>, window_params = [{transform_indices = @transform_0, window_bounds = array<i64: 8, 64>}, {transform_indices = @transform_1, window_bounds = array<i64: 8, 1>}, {transform_indices = @transform_2, window_bounds = array<i64: 1, 8, 128>}]} {
    %c0_i32 = arith.constant 0 : i32
    %0 = arith.cmpi eq, %arg1, %c0_i32 : i32
    %1 = arith.extui %0 : i1 to i32
    %c0_i32_0 = arith.constant 0 : i32
    %2 = arith.cmpi ne, %1, %c0_i32_0 : i32
    scf.if %2 {
      %cst_16 = arith.constant 0.000000e+00 : f32
      %39 = vector.broadcast %cst_16 : f32 to vector<8x1xf32>
      %c0_17 = arith.constant 0 : index
      %c0_18 = arith.constant 0 : index
      %40 = vector.load %arg5[%c0_17, %c0_18] : memref<8x1xf32, #tpu.memory_space<vmem>>, vector<8x1xf32>
      tpu.vector_store %arg5[%c0_17, %c0_18], %39 {strides = array<i32>} : memref<8x1xf32, #tpu.memory_space<vmem>>, vector<8x1xf32>,
    } else {
    }
    %c0 = arith.constant 0 : index
    %c0_1 = arith.constant 0 : index
    %3 = vector.load %arg2[%c0, %c0_1] : memref<8x64xf32, #tpu.memory_space<vmem>>, vector<8x64xf32>
    %c0_2 = arith.constant 0 : index
    %c0_3 = arith.constant 0 : index
    %4 = vector.load %arg3[%c0_2, %c0_3] : memref<8x1xi32, #tpu.memory_space<vmem>>, vector<8x1xi32>
    %cst = arith.constant dense<0xFF800000> : vector<8xf32>
    %5 = vector.multi_reduction <maximumf>, %3, %cst [1] : vector<8x64xf32> to vector<8xf32>
    %6 = vector.shape_cast %5 : vector<8xf32> to vector<8x1xf32>
    %7 = vector.broadcast %6 : vector<8x1xf32> to vector<8x64xf32>
    %8 = arith.subf %3, %7 : vector<8x64xf32>
    %9 = math.exp %8 : vector<8x64xf32>
    %cst_4 = arith.constant dense<0.000000e+00> : vector<8xf32>
    %10 = vector.multi_reduction <add>, %9, %cst_4 [1] : vector<8x64xf32> to vector<8xf32>
    %11 = vector.shape_cast %10 : vector<8xf32> to vector<8x1xf32>
    %12 = math.log %11 : vector<8x1xf32>
    %13 = arith.addf %6, %12 : vector<8x1xf32>
    %14 = tpu.iota {dimensions = array<i32: 1>} : vector<8x64xi32>
    %15 = vector.broadcast %4 : vector<8x1xi32> to vector<8x64xi32>
    %16 = arith.cmpi eq, %14, %15 : vector<8x64xi32>
    %17 = arith.extui %16 : vector<8x64xi1> to vector<8x64xi32>
    %18 = arith.sitofp %17 : vector<8x64xi32> to vector<8x64xf32>
    %19 = arith.mulf %3, %18 : vector<8x64xf32>
    %cst_5 = arith.constant dense<0.000000e+00> : vector<8xf32>
    %20 = vector.multi_reduction <add>, %19, %cst_5 [1] : vector<8x64xf32> to vector<8xf32>
    %21 = vector.shape_cast %20 : vector<8xf32> to vector<8x1xf32>
    %cst_6 = arith.constant dense<0.000000e+00> : vector<8xf32>
    %22 = vector.multi_reduction <add>, %3, %cst_6 [1] : vector<8x64xf32> to vector<8xf32>
    %23 = vector.shape_cast %22 : vector<8xf32> to vector<8x1xf32>
    %cst_7 = arith.constant 1.562500e-02 : f32
    %24 = vector.broadcast %cst_7 : f32 to vector<8x1xf32>
    %25 = arith.mulf %23, %24 : vector<8x1xf32>
    %26 = arith.subf %13, %21 : vector<8x1xf32>
    %27 = arith.subf %13, %25 : vector<8x1xf32>
    %cst_8 = arith.constant 0.899999976 : f32
    %28 = vector.broadcast %cst_8 : f32 to vector<8x1xf32>
    %29 = arith.mulf %28, %26 : vector<8x1xf32>
    %cst_9 = arith.constant 1.000000e-01 : f32
    %30 = vector.broadcast %cst_9 : f32 to vector<8x1xf32>
    %31 = arith.mulf %30, %27 : vector<8x1xf32>
    %32 = arith.addf %29, %31 : vector<8x1xf32>
    %c0_10 = arith.constant 0 : index
    %c0_11 = arith.constant 0 : index
    %33 = vector.load %arg5[%c0_10, %c0_11] : memref<8x1xf32, #tpu.memory_space<vmem>>, vector<8x1xf32>
    %34 = arith.addf %33, %32 : vector<8x1xf32>
    %c0_12 = arith.constant 0 : index
    %c0_13 = arith.constant 0 : index
    %35 = vector.load %arg5[%c0_12, %c0_13] : memref<8x1xf32, #tpu.memory_space<vmem>>, vector<8x1xf32>
    tpu.vector_store %arg5[%c0_12, %c0_13], %34 {strides = array<i32>} : memref<8x1xf32, #tpu.memory_space<vmem>>, vector<8x1xf32>,
    %c0_i32_14 = arith.constant 0 : i32
    %36 = arith.cmpi eq, %arg1, %c0_i32_14 : i32
    %37 = arith.extui %36 : i1 to i32
    %c0_i32_15 = arith.constant 0 : i32
    %38 = arith.cmpi ne, %37, %c0_i32_15 : i32
    scf.if %38 {
      %c0_16 = arith.constant 0 : index
      %c0_17 = arith.constant 0 : index
      %39 = vector.load %arg5[%c0_16, %c0_17] : memref<8x1xf32, #tpu.memory_space<vmem>>, vector<8x1xf32>
      %40 = vector.shape_cast %39 : vector<8x1xf32> to vector<1x8x1xf32>
      %cst_18 = arith.constant dense<0.000000e+00> : vector<1xf32>
      %41 = vector.multi_reduction <add>, %40, %cst_18 [1, 2] : vector<1x8x1xf32> to vector<1xf32>
      %42 = vector.shape_cast %41 : vector<1xf32> to vector<1x1x1xf32>
      %43 = vector.extract %42[0, 0, 0] : f32 from vector<1x1x1xf32>
      %44 = vector.broadcast %43 : f32 to vector<1x8x128xf32>
      %c0_19 = arith.constant 0 : index
      %c0_20 = arith.constant 0 : index
      %c0_21 = arith.constant 0 : index
      %45 = vector.load %arg4[%c0_19, %c0_20, %c0_21] : memref<1x8x128xf32, #tpu.memory_space<vmem>>, vector<1x8x128xf32>
      tpu.vector_store %arg4[%c0_19, %c0_20, %c0_21], %44 {strides = array<i32>} : memref<1x8x128xf32, #tpu.memory_space<vmem>>, vector<1x8x128xf32>,
    } else {
    }
    return
  }
  func.func @transform_0(%arg0: i32, %arg1: i32) -> (i32, i32) {
    %c1_i32 = arith.constant 1 : i32
    %0 = arith.muli %arg0, %c1_i32 : i32
    %1 = arith.addi %0, %arg1 : i32
    %c0_i32 = arith.constant 0 : i32
    %c0_i32_0 = arith.constant 0 : i32
    return %1, %c0_i32 : i32, i32
  }
  func.func @transform_1(%arg0: i32, %arg1: i32) -> (i32, i32) {
    %c1_i32 = arith.constant 1 : i32
    %0 = arith.muli %arg0, %c1_i32 : i32
    %1 = arith.addi %0, %arg1 : i32
    %c0_i32 = arith.constant 0 : i32
    %c0_i32_0 = arith.constant 0 : i32
    return %1, %c0_i32 : i32, i32
  }
  func.func @transform_2(%arg0: i32, %arg1: i32) -> (i32, i32, i32) {
    %c0_i32 = arith.constant 0 : i32
    %c0_i32_0 = arith.constant 0 : i32
    %c0_i32_1 = arith.constant 0 : i32
    return %arg0, %c0_i32, %c0_i32_0 : i32, i32, i32
  }
}

</mosaic_0001>

<bundles_post_ra>
// kernel: tpu_custom_call.1
= control target key start
LH: loop header
LB: loop body
LE: loop exit
PB: predicated region body
PF: predicated region fallthrough
CT: control target
= control target key end

     0   :  { %vm54_vm0 = vcmask 523264   ;;  %s201_s0 = inlined_call_operand.vmem [shape: f32[8,64], index: 0, kind: input, shape index: {}]   ;;  %s202_s1 = inlined_call_operand.vmem [shape: s32[8,1], index: 1, kind: input, shape index: {}]   ;;  %s203_s2 = inlined_call_operand.hbm [shape: f32[1,8,128], index: 2, kind: output, shape index: {}]  }
   0x1   :  { %v52_v0 = vld [vmem:[%s201_s0] sm:$0xff] }
   0x2   :  { %7 = vsyncpa [#allocation4], 0  ;;  %v55_v1 = vsel %vm54_vm0, %v52_v0, -inf  ;;  %v167_v2 = vmov 0   ;;  %v53_v3 = vld [vmem:[%s202_s1] sm:$0xff]  ;;  %v67_v7 = vlaneseq  ;;  %v168_v11 = vmov 0.0  }
   0x3   :  { %140 = vset.pattern.permute.xlu0 %v167_v2  ;;  %v79_v14 = vsel %vm54_vm0, %v52_v0, 0.0  ;;  %vm50_vm2 = vcmask 7168   ;;  %s169_s0 = smov [#allocation3]  }
   0x4   :  { %56 = vmax.xlane.f32.xlu0 %v55_v1  ;;  %v68_v8 = vand.u32 127, %v67_v7  ;;  %51 = vst.msk [vmem:[#allocation2] sm:$0xff] %vm50_vm2, %v168_v11  ;;  %s114_s1 = sshll.u32 %s169_s0, 4  ;;  %s115_s1 = int_to_ptr.vmem [resolvable:$true] %s114_s1 }
   0x5   :  { %s145_s14 = scalar_lea.vmem %s115_s1, 128  ;;  %p150_p1 = scmp.lt.s32.totalorder %s115_s1, %s115_s1 }
   0x6   :  { %p146_p0 = scmp.ne.s32.totalorder %s115_s1, %s145_s14  ;;  %p151_p2 = scmp.lt.s32.totalorder %s145_s14, %s145_s14 }
   0x8   :  { %p152_p3 = por %p151_p2, %p150_p1 }
   0xa   :  { %p153_p4 = pnand %p152_p3, %p146_p0 }
   0xb   :  { %v88_v28 = vld [vmem:[#allocation2] sm:$0xff] }
  0x1a   :  { %70 = vperm.xlu0 %140, %v53_v3  }
  0x8d   :  { %v57_v4 = vpop.xlane.xlu0 %56 }
  0x8e   :  { %v58_v5 = vsub.f32 %v52_v0, %v57_v4 }
  0x90   :  { %v59_v6 = vmul.f32 1.442695, %v58_v5 }
  0x92   :  { %141 = vpow2.f32 %v59_v6 }
  0x95   :  { %v71_v9 = vpop.permute.xlu0 %70 }
  0x96   :  { %vm72_vm1 = vcmp.eq.s32.totalorder %v68_v8, %v71_v9 }
  0x97   :  { %v134_v12 = vsel %vm72_vm1, 1.0, %v168_v11 }
  0x98   :  { %v75_v15 = vmul.f32 %v134_v12, %v52_v0 }
  0x9a   :  { %v76_v16 = vsel %vm54_vm0, %v75_v15, 0.0 }
  0x9f   :  { %v142_v10 = vpop.eup %141 }
  0xa0   :  { %v61_v13 = vsel %vm54_vm0, %v142_v10, 0.0 }
  0xa1   :  { %62 = vadd.xlane.f32.xlu1 %v61_v13 }
  0xa5   :  { %80 = vadd.xlane.f32.xlu1 %v79_v14 }
  0xa9   :  { %77 = vadd.xlane.f32.xlu1 %v76_v16 }
 0x12a   :  { %v63_v17 = vpop.xlane.xlu1 %62 }
 0x12b   :  { %143 = vlog2.f32 %v63_v17 }
 0x12e   :  { %v81_v18 = vpop.xlane.xlu1 %80 }
 0x12f   :  { %v82_v23 = vmul.f32 0.015625, %v81_v18 }
 0x132   :  { %v78_v21 = vpop.xlane.xlu1 %77 }
 0x138   :  { %v144_v19 = vpop.eup %143 }
 0x139   :  { %v65_v20 = vmul.f32 0.6931472, %v144_v19 }
 0x13b   :  { %v66_v22 = vadd.f32 %v65_v20, %v57_v4 }
 0x13d   :  { %v84_v24 = vsub.f32 %v66_v22, %v82_v23  ;;  %v83_v25 = vsub.f32 %v66_v22, %v78_v21 }
 0x13f   :  { %v86_v26 = vmul.f32 0.1, %v84_v24  ;;  %v85_v27 = vmul.f32 0.9, %v83_v25 }
 0x141   :  { %v87_v29 = vadd.f32 %v86_v26, %v85_v27 }
 0x143   :  { %v89_v30 = vadd.f32 %v88_v28, %v87_v29 }
 0x145   :  { %91 = vst.msk [vmem:[#allocation2] sm:$0xff] %vm50_vm2, %v89_v30 }
 0x14c   :  { %v95_v31 = vld [vmem:[#allocation2] sm:$0xff] }
 0x14d   :  { %v96_v32 = vsel %vm50_vm2, %v95_v31, 0.0 }
 0x14e   :  { %97 = vadd.xlane.f32.xlu1 %v96_v32 }
 0x1d7   :  { %v98_v33 = vpop.xlane.xlu1 %97 }
 0x1d8   :  { %v99_v34 = vrot.slane %v98_v33, 4 }
 0x1da   :  { %v100_v35 = vadd.f32 %v99_v34, %v98_v33 }
 0x1dc   :  { %v101_v36 = vrot.slane %v100_v35, 2 }
 0x1de   :  { %v102_v37 = vadd.f32 %v101_v36, %v100_v35 }
 0x1e0   :  { %v103_v38 = vrot.slane %v102_v37, 1 }
 0x1e2   :  { %v104_v39 = vadd.f32 %v103_v38, %v102_v37 }
 0x1e4   :  { %135 = vpush %v104_v39 }
 0x215   :  { %s136_s13 = spop %135 }
 0x216   :  { %v106_v40 = vstv %s136_s13 }
 0x217   :  { %107 = vst [vmem:[#allocation3] sm:$0xff] %v106_v40 }
 0x218   :  { %156 = shalt.err (!%p153_p4)
}
 0x219   :  { %117 = dma.vmem_to_hbm [thread:$0]  %s115_s1, 128, %s203_s2, [#allocation4]  }
 0x21a   :  { %165 = dma.done.wait [#allocation4], 128  }
 0x21b   :  { %166 = vsyncadd [#allocation4], 4294967168 }
 0x21c   :  { %121 = vsyncpa [#allocation4], 1 }

</bundles_post_ra>
